<compile_context>
chip_gen: v5e
topology: v5e:2x2
jax: 0.10.0
libtpu: 0.0.40
codegen_flags: <defaults>
</compile_context>

<pallas_src>
import functools

import jax
import jax.numpy as jnp
from jax.experimental import pallas as pl
from jax.experimental.pallas import tpu as pltpu

NUM_HIDDEN = 40
NUM_LAYERS = 4


def _round_up(a, b):
    return ((a + b - 1) // b) * b


def _mlp_kernel(x_ref, w1_ref, b1_ref, w2_ref, b2_ref, w3_ref, b3_ref, o_ref,
                *, num_layers):
    # Lane-dense transposed layout: the batch tile TM lives on the 128-lane axis.
    #   x_ref : (1, TM)      w1_ref: (H, 1)     b1_ref: (H, 1)
    #   w2_ref: (L, H, H)    b2_ref: (L, H, 1)  (PyTorch (out, in) layout)
    #   w3_ref: (H, 1)       b3_ref: (1, 1) in SMEM
    #   o_ref : (1, TM)
    x = x_ref[...]                                    # (1, TM)

    # fc1 has K=1: do it on the VPU as a broadcast multiply, not the MXU.
    h = jnp.tanh(w1_ref[...] * x + b1_ref[...])       # (H, 1)*(1, TM) -> (H, TM)

    # Hidden layers on the MXU: (H, H) @ (H, TM) -> (H, TM), output lanes = TM.
    for i in range(num_layers):                       # static unroll
        h = jnp.dot(w2_ref[i], h, preferred_element_type=jnp.float32)
        h = jnp.tanh(h + b2_ref[i])

    # fc3 has out_features=1: sublane reduce instead of an N=1 MXU matmul.
    out = jnp.sum(w3_ref[...] * h, axis=0, keepdims=True) + b3_ref[0, 0]
    o_ref[...] = out.astype(o_ref.dtype)              # lane-dense store


def function_estimator_forward(x, params, *, tm=4096):
    """x: (N, 1) float32.  params: dict in (out, in) weight layout.  Returns (N, 1)."""
    N = x.shape[0]
    H = params["w1"].shape[0]
    L = params["w2"].shape[0]

    # Batch tile on the lane axis: multiple of 128, as large as `tm`, but keep
    # >= 2 grid steps when possible so both v7x TensorCores get work.
    n128 = _round_up(max(N, 128), 128)
    tile = min(tm, n128)
    if n128 // tile < 2 and n128 >= 256:
        tile = _round_up(n128 // 2, 128)
    n_pad = _round_up(n128, tile)

    # Pad ragged N and put the batch on the last (lane) axis.
    x_row = jnp.zeros((1, n_pad), jnp.float32).at[0, :N].set(x[:, 0])

    kernel = functools.partial(_mlp_kernel, num_layers=L)

    grid_spec = pltpu.PrefetchScalarGridSpec(
        num_scalar_prefetch=0,
        grid=(n_pad // tile,),
        in_specs=[
            pl.BlockSpec((1, tile), lambda i: (0, i)),          # x tile (lane-dense)
            pl.BlockSpec((H, 1), lambda i: (0, 0)),             # w1 (VMEM-resident)
            pl.BlockSpec((H, 1), lambda i: (0, 0)),             # b1
            pl.BlockSpec((L, H, H), lambda i: (0, 0, 0)),       # w2 stack
            pl.BlockSpec((L, H, 1), lambda i: (0, 0, 0)),       # b2 stack
            pl.BlockSpec((H, 1), lambda i: (0, 0)),             # w3
            pl.BlockSpec(memory_space=pltpu.MemorySpace.SMEM),  # b3 scalar
        ],
        out_specs=pl.BlockSpec((1, tile), lambda i: (0, i)),    # lane-dense output
    )

    out_row = pl.pallas_call(
        kernel,
        out_shape=jax.ShapeDtypeStruct((1, n_pad), jnp.float32),
        grid_spec=grid_spec,
        compiler_params=pltpu.CompilerParams(
            dimension_semantics=("parallel",)),
    )(x_row, params["w1"], params["b1"], params["w2"], params["b2"],
      params["w3"], params["b3"])

    return out_row[0, :N].reshape(N, 1)


def init_params(key, num_hidden=NUM_HIDDEN, num_layers=NUM_LAYERS):
    """nn.Linear-style U(-1/sqrt(fan_in), 1/sqrt(fan_in)) init, (out, in) layout."""
    ks = jax.random.split(key, 6)

    def uni(k, shape, fan_in):
        bound = 1.0 / jnp.sqrt(jnp.float32(fan_in))
        return jax.random.uniform(k, shape, jnp.float32, -bound, bound)

    H, L = num_hidden, num_layers
    return {
        "w1": uni(ks[0], (H, 1), 1),      # fc1.weight  (out=H, in=1)
        "b1": uni(ks[1], (H, 1), 1),      # fc1.bias
        "w2": uni(ks[2], (L, H, H), H),   # fc2[i].weight (out, in)
        "b2": uni(ks[3], (L, H, 1), H),   # fc2[i].bias
        "w3": uni(ks[4], (H, 1), H),      # fc3.weight (stored transposed: (in=H, out=1))
        "b3": uni(ks[5], (1, 1), H),      # fc3.bias
    }


def reference_forward(x, params):
    """Pure-JAX reference of the PyTorch forward (tanh activation)."""
    h = jnp.tanh(x @ params["w1"].T + params["b1"].T)             # (N, H)
    for i in range(params["w2"].shape[0]):
        h = jnp.tanh(h @ params["w2"][i].T + params["b2"][i].T)   # (N, H)
    return h @ params["w3"] + params["b3"]                        # (N, 1)


if __name__ == "__main__":
    key = jax.random.PRNGKey(0)
    kp, kx = jax.random.split(key)

    params = init_params(kp)
    N = 1000                               # 2-D input (N, 1), exercises padding
    x = jax.random.uniform(kx, (N, 1), jnp.float32, -2.0, 2.0)

    out = function_estimator_forward(x, params)
    out = jax.block_until_ready(out)

    ref = reference_forward(x, params)
    assert out.shape == (N, 1)
    assert jnp.allclose(out, ref, atol=1e-4, rtol=1e-4), "mismatch vs reference"

    print("KERNEL_OK")
</pallas_src>

<mosaic_0001>
module attributes {stable_mosaic.version = 11 : i64} {
  func.func @_mlp_kernel(%arg0: i32, %arg1: memref<1x512xf32, #tpu.memory_space<vmem>>, %arg2: memref<40x1xf32, #tpu.memory_space<vmem>>, %arg3: memref<40x1xf32, #tpu.memory_space<vmem>>, %arg4: memref<4x40x40xf32, #tpu.memory_space<vmem>>, %arg5: memref<4x40x1xf32, #tpu.memory_space<vmem>>, %arg6: memref<40x1xf32, #tpu.memory_space<vmem>>, %arg7: memref<1x1xf32, #tpu.memory_space<smem>>, %arg8: memref<1x512xf32, #tpu.memory_space<vmem>>) attributes {dimension_semantics = [#tpu.dimension_semantics<parallel>], iteration_bounds = array<i64: 2>, scalar_prefetch = 0 : i64, scratch_operands = 0 : i64, tpu.core_type = #tpu.core_type<tc>, window_params = [{transform_indices = @transform_0, window_bounds = array<i64: 1, 512>}, {pipeline_mode = #tpu.pipeline_mode<synchronous>, transform_indices = @transform_1, window_bounds = array<i64: 40, 1>}, {pipeline_mode = #tpu.pipeline_mode<synchronous>, transform_indices = @transform_2, window_bounds = array<i64: 40, 1>}, {pipeline_mode = #tpu.pipeline_mode<synchronous>, transform_indices = @transform_3, window_bounds = array<i64: 4, 40, 40>}, {pipeline_mode = #tpu.pipeline_mode<synchronous>, transform_indices = @transform_4, window_bounds = array<i64: 4, 40, 1>}, {pipeline_mode = #tpu.pipeline_mode<synchronous>, transform_indices = @transform_5, window_bounds = array<i64: 40, 1>}, {transform_indices = @transform_6, window_bounds = array<i64: 1, 1>}, {transform_indices = @transform_7, window_bounds = array<i64: 1, 512>}]} {
    %c0 = arith.constant 0 : index
    %c0_0 = arith.constant 0 : index
    %0 = vector.load %arg1[%c0, %c0_0] : memref<1x512xf32, #tpu.memory_space<vmem>>, vector<1x512xf32>
    %c0_1 = arith.constant 0 : index
    %c0_2 = arith.constant 0 : index
    %1 = vector.load %arg2[%c0_1, %c0_2] : memref<40x1xf32, #tpu.memory_space<vmem>>, vector<40x1xf32>
    %2 = vector.broadcast %1 : vector<40x1xf32> to vector<40x512xf32>
    %3 = vector.broadcast %0 : vector<1x512xf32> to vector<40x512xf32>
    %4 = arith.mulf %2, %3 : vector<40x512xf32>
    %c0_3 = arith.constant 0 : index
    %c0_4 = arith.constant 0 : index
    %5 = vector.load %arg3[%c0_3, %c0_4] : memref<40x1xf32, #tpu.memory_space<vmem>>, vector<40x1xf32>
    %6 = vector.broadcast %5 : vector<40x1xf32> to vector<40x512xf32>
    %7 = arith.addf %4, %6 : vector<40x512xf32>
    %8 = math.tanh %7 : vector<40x512xf32>
    %c0_5 = arith.constant 0 : index
    %c0_6 = arith.constant 0 : index
    %c0_7 = arith.constant 0 : index
    %9 = vector.load %arg4[%c0_5, %c0_6, %c0_7] : memref<4x40x40xf32, #tpu.memory_space<vmem>>, vector<1x40x40xf32>
    %10 = vector.shape_cast %9 : vector<1x40x40xf32> to vector<40x40xf32>
    %cst = arith.constant dense<0.000000e+00> : vector<40x512xf32>
    %11 = tpu.matmul %10, %8, %cst {dimension_numbers = #tpu.dot_dimension_numbers<[1], [0], [0], [1], [0, 0, 1, 1], [], []>} : vector<40x40xf32>, vector<40x512xf32>, vector<40x512xf32> -> vector<40x512xf32>
    %c0_8 = arith.constant 0 : index
    %c0_9 = arith.constant 0 : index
    %c0_10 = arith.constant 0 : index
    %12 = vector.load %arg5[%c0_8, %c0_9, %c0_10] : memref<4x40x1xf32, #tpu.memory_space<vmem>>, vector<1x40x1xf32>
    %13 = vector.shape_cast %12 : vector<1x40x1xf32> to vector<40x1xf32>
    %14 = vector.broadcast %13 : vector<40x1xf32> to vector<40x512xf32>
    %15 = arith.addf %11, %14 : vector<40x512xf32>
    %16 = math.tanh %15 : vector<40x512xf32>
    %c1 = arith.constant 1 : index
    %c0_11 = arith.constant 0 : index
    %c0_12 = arith.constant 0 : index
    %17 = vector.load %arg4[%c1, %c0_11, %c0_12] : memref<4x40x40xf32, #tpu.memory_space<vmem>>, vector<1x40x40xf32>
    %18 = vector.shape_cast %17 : vector<1x40x40xf32> to vector<40x40xf32>
    %cst_13 = arith.constant dense<0.000000e+00> : vector<40x512xf32>
    %19 = tpu.matmul %18, %16, %cst_13 {dimension_numbers = #tpu.dot_dimension_numbers<[1], [0], [0], [1], [0, 0, 1, 1], [], []>} : vector<40x40xf32>, vector<40x512xf32>, vector<40x512xf32> -> vector<40x512xf32>
    %c1_14 = arith.constant 1 : index
    %c0_15 = arith.constant 0 : index
    %c0_16 = arith.constant 0 : index
    %20 = vector.load %arg5[%c1_14, %c0_15, %c0_16] : memref<4x40x1xf32, #tpu.memory_space<vmem>>, vector<1x40x1xf32>
    %21 = vector.shape_cast %20 : vector<1x40x1xf32> to vector<40x1xf32>
    %22 = vector.broadcast %21 : vector<40x1xf32> to vector<40x512xf32>
    %23 = arith.addf %19, %22 : vector<40x512xf32>
    %24 = math.tanh %23 : vector<40x512xf32>
    %c2 = arith.constant 2 : index
    %c0_17 = arith.constant 0 : index
    %c0_18 = arith.constant 0 : index
    %25 = vector.load %arg4[%c2, %c0_17, %c0_18] : memref<4x40x40xf32, #tpu.memory_space<vmem>>, vector<1x40x40xf32>
    %26 = vector.shape_cast %25 : vector<1x40x40xf32> to vector<40x40xf32>
    %cst_19 = arith.constant dense<0.000000e+00> : vector<40x512xf32>
    %27 = tpu.matmul %26, %24, %cst_19 {dimension_numbers = #tpu.dot_dimension_numbers<[1], [0], [0], [1], [0, 0, 1, 1], [], []>} : vector<40x40xf32>, vector<40x512xf32>, vector<40x512xf32> -> vector<40x512xf32>
    %c2_20 = arith.constant 2 : index
    %c0_21 = arith.constant 0 : index
    %c0_22 = arith.constant 0 : index
    %28 = vector.load %arg5[%c2_20, %c0_21, %c0_22] : memref<4x40x1xf32, #tpu.memory_space<vmem>>, vector<1x40x1xf32>
    %29 = vector.shape_cast %28 : vector<1x40x1xf32> to vector<40x1xf32>
    %30 = vector.broadcast %29 : vector<40x1xf32> to vector<40x512xf32>
    %31 = arith.addf %27, %30 : vector<40x512xf32>
    %32 = math.tanh %31 : vector<40x512xf32>
    %c3 = arith.constant 3 : index
    %c0_23 = arith.constant 0 : index
    %c0_24 = arith.constant 0 : index
    %33 = vector.load %arg4[%c3, %c0_23, %c0_24] : memref<4x40x40xf32, #tpu.memory_space<vmem>>, vector<1x40x40xf32>
    %34 = vector.shape_cast %33 : vector<1x40x40xf32> to vector<40x40xf32>
    %cst_25 = arith.constant dense<0.000000e+00> : vector<40x512xf32>
    %35 = tpu.matmul %34, %32, %cst_25 {dimension_numbers = #tpu.dot_dimension_numbers<[1], [0], [0], [1], [0, 0, 1, 1], [], []>} : vector<40x40xf32>, vector<40x512xf32>, vector<40x512xf32> -> vector<40x512xf32>
    %c3_26 = arith.constant 3 : index
    %c0_27 = arith.constant 0 : index
    %c0_28 = arith.constant 0 : index
    %36 = vector.load %arg5[%c3_26, %c0_27, %c0_28] : memref<4x40x1xf32, #tpu.memory_space<vmem>>, vector<1x40x1xf32>
    %37 = vector.shape_cast %36 : vector<1x40x1xf32> to vector<40x1xf32>
    %38 = vector.broadcast %37 : vector<40x1xf32> to vector<40x512xf32>
    %39 = arith.addf %35, %38 : vector<40x512xf32>
    %40 = math.tanh %39 : vector<40x512xf32>
    %c0_29 = arith.constant 0 : index
    %c0_30 = arith.constant 0 : index
    %41 = vector.load %arg6[%c0_29, %c0_30] : memref<40x1xf32, #tpu.memory_space<vmem>>, vector<40x1xf32>
    %42 = vector.broadcast %41 : vector<40x1xf32> to vector<40x512xf32>
    %43 = arith.mulf %42, %40 : vector<40x512xf32>
    %cst_31 = arith.constant dense<0.000000e+00> : vector<512xf32>
    %44 = vector.multi_reduction <add>, %43, %cst_31 [0] : vector<40x512xf32> to vector<512xf32>
    %45 = vector.shape_cast %44 : vector<512xf32> to vector<1x512xf32>
    %c0_32 = arith.constant 0 : index
    %c0_33 = arith.constant 0 : index
    %46 = memref.load %arg7[%c0_32, %c0_33] : memref<1x1xf32, #tpu.memory_space<smem>>
    %47 = vector.broadcast %46 : f32 to vector<1x512xf32>
    %48 = arith.addf %45, %47 : vector<1x512xf32>
    %c0_34 = arith.constant 0 : index
    %c0_35 = arith.constant 0 : index
    %49 = vector.load %arg8[%c0_34, %c0_35] : memref<1x512xf32, #tpu.memory_space<vmem>>, vector<1x512xf32>
    tpu.vector_store %arg8[%c0_34, %c0_35], %48 {strides = array<i32>} : memref<1x512xf32, #tpu.memory_space<vmem>>, vector<1x512xf32>,
    return
  }
  func.func @transform_0(%arg0: i32) -> (i32, i32) {
    %c0_i32 = arith.constant 0 : i32
    %c0_i32_0 = arith.constant 0 : i32
    return %c0_i32, %arg0 : i32, i32
  }
  func.func @transform_1(%arg0: i32) -> (i32, i32) {
    %c0_i32 = arith.constant 0 : i32
    %c0_i32_0 = arith.constant 0 : i32
    %c0_i32_1 = arith.constant 0 : i32
    return %c0_i32, %c0_i32_0 : i32, i32
  }
  func.func @transform_2(%arg0: i32) -> (i32, i32) {
    %c0_i32 = arith.constant 0 : i32
    %c0_i32_0 = arith.constant 0 : i32
    %c0_i32_1 = arith.constant 0 : i32
    return %c0_i32, %c0_i32_0 : i32, i32
  }
  func.func @transform_3(%arg0: i32) -> (i32, i32, i32) {
    %c0_i32 = arith.constant 0 : i32
    %c0_i32_0 = arith.constant 0 : i32
    %c0_i32_1 = arith.constant 0 : i32
    %c0_i32_2 = arith.constant 0 : i32
    return %c0_i32, %c0_i32_0, %c0_i32_1 : i32, i32, i32
  }
  func.func @transform_4(%arg0: i32) -> (i32, i32, i32) {
    %c0_i32 = arith.constant 0 : i32
    %c0_i32_0 = arith.constant 0 : i32
    %c0_i32_1 = arith.constant 0 : i32
    %c0_i32_2 = arith.constant 0 : i32
    return %c0_i32, %c0_i32_0, %c0_i32_1 : i32, i32, i32
  }
  func.func @transform_5(%arg0: i32) -> (i32, i32) {
    %c0_i32 = arith.constant 0 : i32
    %c0_i32_0 = arith.constant 0 : i32
    %c0_i32_1 = arith.constant 0 : i32
    return %c0_i32, %c0_i32_0 : i32, i32
  }
  func.func @transform_6(%arg0: i32) -> (i32, i32) {
    %c0_i32 = arith.constant 0 : i32
    %c0_i32_0 = arith.constant 0 : i32
    %c0_i32_1 = arith.constant 0 : i32
    return %c0_i32, %c0_i32_0 : i32, i32
  }
  func.func @transform_7(%arg0: i32) -> (i32, i32) {
    %c0_i32 = arith.constant 0 : i32
    %c0_i32_0 = arith.constant 0 : i32
    return %c0_i32, %arg0 : i32, i32
  }
}

</mosaic_0001>

<bundles_post_ra>
// kernel: tpu_custom_call.1
= control target key start
LH: loop header
LB: loop body
LE: loop exit
PB: predicated region body
PF: predicated region fallthrough
CT: control target
= control target key end

     0   :  { %s2305_s0 = inlined_call_operand.vmem [shape: f32[1,1024], index: 0, kind: input, shape index: {}]   ;;  %s2306_s1 = inlined_call_operand.vmem [shape: f32[40,1], index: 1, kind: input, shape index: {}]   ;;  %s2307_s2 = inlined_call_operand.vmem [shape: f32[40,1], index: 2, kind: input, shape index: {}]   ;;  %s2308_s3 = inlined_call_operand.vmem [shape: f32[4,40,40], index: 3, kind: input, shape index: {}]   ;;  %s2309_s4 = inlined_call_operand.vmem [shape: f32[4,40,1], index: 4, kind: input, shape index: {}]   ;;  %s2310_s5 = inlined_call_operand.vmem [shape: f32[40,1], index: 5, kind: input, shape index: {}]   ;;  %s2311_s6 = inlined_call_operand.<no memory space> [shape: f32[1,1], index: 6, kind: input, shape index: {}]   ;;  %s2312_s7 = inlined_call_operand.hbm [shape: f32[1,1024], index: 7, kind: output, shape index: {}]  }
   0x1   :  { %12 = sst [smem:[#allocation2]] %s2311_s6 }
   0x2   :  { %13 = vsyncpa [#allocation4], 0 }
   0x3   :  { %15 = vsyncpa [#allocation4 + $0x1], 0  ;;  %s1865_s26 = smov 0   ;;  %s1867_s27 = smov 0  }
   0x4   :  { %s1869_s28 = smov 0   ;;  %s1871_s29 = smov 0  }
   0x5 LB: > { %s1393_s6 = sadd.s32 4294967295, %s1819_s29   ;;  %s1394_s30 = sadd.s32 4294967294, %s1819_s29   ;;  %s1819_s29 = sphi %s1871_s29, %s2318_s29   ;;  %s1815_s28 = sphi %s1869_s28, %s2317_s28   ;;  %s1811_s27 = sphi %s1867_s27, %s2316_s27   ;;  %s1807_s26 = sphi %s1865_s26, %s2315_s26  }
   0x6   : > { %s1888_s8 = sadd.s32 1, %s1819_s29   ;;  %s180_s9 = sadd.s32 1, %s1815_s28 }
   0x7   : > { %s177_s10 = ssub.s32 %s1819_s29, %s1888_s8  ;;  %p190_p0 = scmp.ne.s32.totalorder %s1815_s28, %s1811_s27 }
   0x8   : > { %p178_p1 = scmp.eq.s32.totalorder %s177_s10, 0  ;;  %p191_p2 = scmp.eq.s32.totalorder %s1393_s6, 1 }
   0x9   : > { %p196_p3 = scmp.ne.s32.totalorder %s1811_s27, %s1807_s26  ;;  %p197_p4 = scmp.eq.s32.totalorder %s1394_s30, 1 }
   0xa   : > { %s1900_s11 = scalar_select %p178_p1, %s1815_s28, %s180_s9  }
   0xb   : > { %p1902_p5 = por %p191_p2, %p190_p0  ;;  %p1906_p6 = por %p197_p4, %p196_p3 }
   0xc   : > { %p1397_p7 = scmp.ge.s32.totalorder %s1819_s29, 1  ;;  %p241_p8 = scmp.lt.s32.totalorder %s1819_s29, 3 }
   0xe   : > { %p242_p9 = pnand %p1397_p7, %p241_p8 }
   0xf   : > { %s2019_s24 = sshll.u32 (!%p242_p9), %s1393_s6, 2  ;;  %s1297_s23 = sld [smem:[#allocation2]] (!%p242_p9) }
  0x10   : > { %245 = sbr.rel (%p242_p9) target bundleno = 920 (0x398), region = 48  ;;  %p273_p10 = scmp.lt.s32.totalorder (!%p242_p9), %s2019_s24, 7 }
  0x11   : > { %s1333_s6 = scalar_lea.hbm (!%p242_p9), %s2312_s7, %s2019_s24  ;;  %s1777_s21 = scalar_lea.hbm (!%p242_p9), %s2312_s7, 8 }
  0x12   : > { %s1337_s16 = sshll.u32 (!%p242_p9), %s1333_s6, 4  ;;  %s1338_s16 = int_to_ptr.hbm [resolvable:$true] %s1337_s16 }
  0x13   : > { %s1771_s17 = sshra.s32 (!%p242_p9), %s1338_s16, 4  ;;  %s1772_s17 = int_to_ptr.hbm [resolvable:$true] %s1771_s17 }
  0x14   : > { %s1773_s18 = scalar_lea.hbm (!%p242_p9), %s1772_s17, 4  ;;  %p1778_p0 = scmp.lt.s32.totalorder (!%p242_p9), %s1772_s17, %s2312_s7 }
  0x15   : > { %v341_v0 = vld [vmem:[%s2307_s2 + $0x18] sm:$0xff]  ;;  %v342_v1 = vld [vmem:[%s2307_s2 + $0x20] sm:$0xff]  ;;  %v1821_v3 = vmov 0   ;;  %v280_v4 = vld [vmem:[%s2306_s1 + $0x8] sm:$0xff]  ;;  %s274_s25 = scalar_select %p273_p10, %s2019_s24, 7  ;;  %vm443_vm0 = vcmask 326656  }
  0x16   : > { %v283_v2 = vld [vmem:[%s2306_s1 + $0x20] sm:$0xff]  ;;  %1556 = vset.pattern.permute.xlu2 %v1821_v3  ;;  %1555 = vset.pattern.permute.xlu1 %v1821_v3  ;;  %v282_v5 = vld [vmem:[%s2306_s1 + $0x18] sm:$0xff]  ;;  %v281_v6 = vld [vmem:[%s2306_s1 + $0x10] sm:$0xff]  ;;  %vm1310_vm1 = vcmask 1040384   ;;  %vm1312_vm2 = vcmask 1042434   ;;  %vm1314_vm3 = vcmask 1041408   ;;  %p1774_p11 = scmp.ne.s32.totalorder %s1772_s17, %s1773_s18  ;;  %p1779_p1 = scmp.lt.s32.totalorder %s1777_s21, %s1773_s18 }
  0x17   : > { %1554 = vset.pattern.permute.xlu0 %v1821_v3  ;;  %360 = vperm.xlu2 %1556, %v341_v0   ;;  %v339_v7 = vld [vmem:[%s2307_s2 + $0x8] sm:$0xff]  ;;  %v340_v8 = vld [vmem:[%s2307_s2 + $0x10] sm:$0xff]  ;;  %v279_v9 = vld [vmem:[%s2306_s1] sm:$0xff]  ;;  %s275_s10 = scalar_lea.vmem %s2305_s0, %s274_s25  ;;  %s269_s25 = sand.u32 1, %s1811_s27  }
  0x18   : > { %365 = vperm.xlu1 %1555, %v342_v1   ;;  %306 = vperm.xlu0 %1554, %v283_v2   ;;  %v416_v10 = vld [vmem:[%s2309_s4 + $0x18] sm:$0xff]  ;;  %v338_v11 = vld [vmem:[%s2307_s2] sm:$0xff]  ;;  %v415_v14 = vld [vmem:[%s2309_s4 + $0x10] sm:$0xff]  ;;  %s1398_s30 = sshll.u32 %s269_s25, 2  ;;  %s1323_s24 = scalar_lea.sflag [#allocation4], %s269_s25 }
  0x19   : > { %v417_v12 = vld [vmem:[%s2309_s4 + $0x20] sm:$0xff]  ;;  %v414_v15 = vld [vmem:[%s2309_s4 + $0x8] sm:$0xff]  ;;  %v1427_v16 = vld [vmem:[%s2309_s4 + $0x38] sm:$0xff]  ;;  %s271_s14 = scalar_lea.vmem [#allocation3], %s1398_s30  ;;  %p1775_p12 = pnand %p1774_p11, %p1902_p5 }
  0x1a   : > { %v413_v13 = vld [vmem:[%s2309_s4] sm:$0xff]  ;;  %v1429_v17 = vld [vmem:[%s2309_s4 + $0x48] sm:$0xff]  ;;  %v1459_v19 = vld [vmem:[%s2309_s4 + $0x70] sm:$0xff]  ;;  %s1335_s15 = sshll.u32 %s271_s14, 4  ;;  %p1780_p2 = por %p1779_p1, %p1778_p0  ;;  %s1336_s15 = int_to_ptr.vmem [resolvable:$true] %s1335_s15 }
  0x1b   : > { %v1428_v18 = vld [vmem:[%s2309_s4 + $0x40] sm:$0xff]  ;;  %v1426_v20 = vld [vmem:[%s2309_s4 + $0x30] sm:$0xff]  ;;  %v1425_v21 = vld [vmem:[%s2309_s4 + $0x28] sm:$0xff]  ;;  %p1776_p13 = pneg %p1775_p12 }
  0x1c   : > { %v1456_v22 = vld [vmem:[%s2309_s4 + $0x58] sm:$0xff]  ;;  %v1458_v23 = vld [vmem:[%s2309_s4 + $0x68] sm:$0xff]  ;;  %v1457_v24 = vld [vmem:[%s2309_s4 + $0x60] sm:$0xff] }
  0x1d   : > { %v1486_v25 = vld [vmem:[%s2309_s4 + $0x80] sm:$0xff]  ;;  %v1455_v26 = vld [vmem:[%s2309_s4 + $0x50] sm:$0xff]  ;;  %v1485_v27 = vld [vmem:[%s2309_s4 + $0x78] sm:$0xff]  ;;  %p1781_p3 = pnand %p1780_p2, %p1776_p13 }
  0x1e   : > { %v1489_v28 = vld [vmem:[%s2309_s4 + $0x98] sm:$0xff]  ;;  %v1487_v29 = vld [vmem:[%s2309_s4 + $0x88] sm:$0xff]  ;;  %v1488_v30 = vld [vmem:[%s2309_s4 + $0x90] sm:$0xff] }
  0x1f   : > { %291 = vperm.xlu2 %1556, %v280_v4   ;;  %v1209_v31 = vld [vmem:[%s2310_s5 + $0x10] sm:$0xff]  ;;  %v1207_v32 = vld [vmem:[%s2310_s5] sm:$0xff]  ;;  %v1208_v33 = vld [vmem:[%s2310_s5 + $0x8] sm:$0xff] }
  0x20   : > { %301 = vperm.xlu0 %1554, %v282_v5   ;;  %296 = vperm.xlu1 %1555, %v281_v6   ;;  %v1210_v34 = vld [vmem:[%s2310_s5 + $0x18] sm:$0xff]  ;;  %v1211_v35 = vld [vmem:[%s2310_s5 + $0x20] sm:$0xff] }
  0x21   : > { %v278_v37 = vld [vmem:[%s275_s10] sm:$0xf] }
  0x22   : > { %v2026_v38 = vperm.slane %v278_v37, 0  ;;  %v2028_v39 = vperm.slane %v278_v37, 1  ;;  %v2030_v40 = vperm.slane %v278_v37, 2  ;;  %v2032_v41 = vperm.slane %v278_v37, 3 }
  0x27   : > { %350 = vperm.xlu2 %1556, %v339_v7  }
  0x28   : > { %355 = vperm.xlu0 %1554, %v340_v8   ;;  %286 = vperm.xlu1 %1555, %v279_v9  }
  0x2f   : > { %435 = vperm.xlu2 %1556, %v416_v10  }
  0x30   : > { %345 = vperm.xlu0 %1554, %v338_v11   ;;  %440 = vperm.xlu1 %1555, %v417_v12  }
  0x37   : > { %420 = vperm.xlu2 %1556, %v413_v13  }
  0x38   : > { %430 = vperm.xlu0 %1554, %v415_v14   ;;  %425 = vperm.xlu1 %1555, %v414_v15  }
  0x3f   : > { %631 = vperm.xlu2 %1556, %v1427_v16  }
  0x40   : > { %641 = vperm.xlu0 %1554, %v1429_v17   ;;  %636 = vperm.xlu1 %1555, %v1428_v18  }
  0x47   : > { %841 = vperm.xlu2 %1556, %v1459_v19  }
  0x48   : > { %626 = vperm.xlu0 %1554, %v1426_v20   ;;  %621 = vperm.xlu1 %1555, %v1425_v21  }
  0x4f   : > { %826 = vperm.xlu2 %1556, %v1456_v22  }
  0x50   : > { %836 = vperm.xlu0 %1554, %v1458_v23   ;;  %831 = vperm.xlu1 %1555, %v1457_v24  }
  0x57   : > { %1026 = vperm.xlu2 %1556, %v1486_v25  }
  0x58   : > { %821 = vperm.xlu0 %1554, %v1455_v26   ;;  %1021 = vperm.xlu1 %1555, %v1485_v27  }
  0x5f   : > { %1041 = vperm.xlu2 %1556, %v1489_v28  }
  0x60   : > { %1031 = vperm.xlu0 %1554, %v1487_v29   ;;  %1036 = vperm.xlu1 %1555, %v1488_v30  }
  0x67   : > { %1224 = vperm.xlu2 %1556, %v1209_v31  }
  0x68   : > { %1214 = vperm.xlu0 %1554, %v1207_v32   ;;  %1219 = vperm.xlu1 %1555, %v1208_v33  }
  0x70   : > { %1229 = vperm.xlu0 %1554, %v1210_v34   ;;  %1234 = vperm.xlu1 %1555, %v1211_v35  }
  0x71   : > { %v361_v36 = vpop.permute.xlu2 %360 }
  0x79   : > { %v292_v48 = vpop.permute.xlu2 %291 }
  0x7a   : > { %v322_v53 = vmul.f32 %v2026_v38, %v292_v48  ;;  %v323_v59 = vmul.f32 %v2028_v39, %v292_v48  ;;  %v324_v7 = vmul.f32 %v2030_v40, %v292_v48  ;;  %v325_v12 = vmul.f32 %v2032_v41, %v292_v48  ;;  %v409_v48 = vld [vmem:[%s2308_s3 + $0x8] sm:$0xff] }
  0x81   : > { %v351_v2 = vpop.permute.xlu2 %350 }
  0x82   : > { %v372_v5 = vadd.f32 %v351_v2, %v322_v53  ;;  %v373_v8 = vadd.f32 %v351_v2, %v323_v59  ;;  %v374_v20 = vadd.f32 %v351_v2, %v324_v7  ;;  %v375_v22 = vadd.f32 %v351_v2, %v325_v12 }
  0x8a   : > { %v366_v42 = vpop.permute.xlu1 %365  ;;  %v307_v43 = vpop.permute.xlu0 %306 }
  0x8b   : > { %v334_v44 = vmul.f32 %v2026_v38, %v307_v43  ;;  %v335_v45 = vmul.f32 %v2028_v39, %v307_v43  ;;  %v336_v46 = vmul.f32 %v2030_v40, %v307_v43  ;;  %v337_v47 = vmul.f32 %v2032_v41, %v307_v43 }
  0x8d   : > { %v384_v49 = vadd.f32 %v366_v42, %v334_v44  ;;  %v385_v50 = vadd.f32 %v366_v42, %v335_v45  ;;  %v386_v51 = vadd.f32 %v366_v42, %v336_v46  ;;  %v387_v52 = vadd.f32 %v366_v42, %v337_v47 }
  0x8f   : > { %1557 = vtanh.f32 %v384_v49  ;;  %v410_v49 = vld [vmem:[%s2308_s3 + $0x10] sm:$0xff] }
  0x90   : > { %1559 = vtanh.f32 %v385_v50  ;;  %v411_v50 = vld [vmem:[%s2308_s3 + $0x18] sm:$0xff] }
  0x91   : > { %1561 = vtanh.f32 %v386_v51  ;;  %v412_v51 = vld [vmem:[%s2308_s3 + $0x20] sm:$0xff] }
  0x92   : > { %v302_v54 = vpop.permute.xlu0 %301  ;;  %1563 = vtanh.f32 %v387_v52  ;;  %v297_v60 = vpop.permute.xlu1 %296 }
  0x93   : > { %v330_v55 = vmul.f32 %v2026_v38, %v302_v54  ;;  %v331_v56 = vmul.f32 %v2028_v39, %v302_v54  ;;  %v332_v57 = vmul.f32 %v2030_v40, %v302_v54  ;;  %v333_v58 = vmul.f32 %v2032_v41, %v302_v54 }
  0x94   : > { %v326_v9 = vmul.f32 %v2026_v38, %v297_v60  ;;  %v327_v10 = vmul.f32 %v2028_v39, %v297_v60  ;;  %v328_v11 = vmul.f32 %v2030_v40, %v297_v60  ;;  %v329_v13 = vmul.f32 %v2032_v41, %v297_v60 }
  0x95   : > { %v1558_v61 = vpop.eup %1557  ;;  %v380_v62 = vadd.f32 %v361_v36, %v330_v55  ;;  %v381_v63 = vadd.f32 %v361_v36, %v331_v56  ;;  %v382_v0 = vadd.f32 %v361_v36, %v332_v57  ;;  %v383_v3 = vadd.f32 %v361_v36, %v333_v58 }
  0x96   : > { %v1560_v1 = vpop.eup %1559  ;;  %470 = vmatpush.msra.mxu0 %v1558_v61 }
  0x97   : > { %v1562_v4 = vpop.eup %1561  ;;  %502 = vmatpush.msra.mxu1 %v1560_v1  ;;  %1565 = vtanh.f32 %v380_v62  ;;  %v436_v62 = vpop.permute.xlu2 %435 }
  0x98   : > { %v1564_v6 = vpop.eup %1563  ;;  %534 = vmatpush.msra.mxu2 %v1562_v4  ;;  %1567 = vtanh.f32 %v381_v63 }
  0x99   : > { %566 = vmatpush.msra.mxu3 %v1564_v6  ;;  %1569 = vtanh.f32 %v382_v0 }
  0x9a   : > { %v356_v14 = vpop.permute.xlu0 %355  ;;  %1571 = vtanh.f32 %v383_v3  ;;  %v287_v23 = vpop.permute.xlu1 %286 }
  0x9b   : > { %1573 = vtanh.f32 %v372_v5  ;;  %v376_v15 = vadd.f32 %v356_v14, %v326_v9  ;;  %v377_v16 = vadd.f32 %v356_v14, %v327_v10  ;;  %v378_v17 = vadd.f32 %v356_v14, %v328_v11 }
  0x9c   : > { %1575 = vtanh.f32 %v373_v8  ;;  %v379_v18 = vadd.f32 %v356_v14, %v329_v13  ;;  %v318_v27 = vmul.f32 %v2026_v38, %v287_v23  ;;  %v319_v28 = vmul.f32 %v2028_v39, %v287_v23 }
  0x9d   : > { %v1566_v19 = vpop.eup %1565  ;;  %1577 = vtanh.f32 %v376_v15  ;;  %v320_v29 = vmul.f32 %v2030_v40, %v287_v23  ;;  %v321_v31 = vmul.f32 %v2032_v41, %v287_v23  ;;  %v408_v41 = vld [vmem:[%s2308_s3] sm:$0xff] }
  0x9e   : > { %v1568_v21 = vpop.eup %1567  ;;  %1579 = vtanh.f32 %v377_v16  ;;  %471 = vmatpush.msra.mxu0 %v1566_v19 }
  0x9f   : > { %v1570_v24 = vpop.eup %1569  ;;  %1581 = vtanh.f32 %v378_v17  ;;  %503 = vmatpush.msra.mxu1 %v1568_v21  ;;  %v421_v4 = vpop.permute.xlu2 %420 }
  0xa0   : > { %v1572_v25 = vpop.eup %1571  ;;  %1583 = vtanh.f32 %v379_v18  ;;  %535 = vmatpush.msra.mxu2 %v1570_v24 }
  0xa1   : > { %v1574_v26 = vpop.eup %1573  ;;  %1585 = vtanh.f32 %v374_v20  ;;  %567 = vmatpush.msra.mxu3 %v1572_v25 }
  0xa2   : > { %v1576_v30 = vpop.eup %1575  ;;  %1587 = vtanh.f32 %v375_v22  ;;  %v346_v32 = vpop.permute.xlu0 %345 }
  0xa3   : > { %v1578_v33 = vpop.eup %1577  ;;  %v368_v34 = vadd.f32 %v346_v32, %v318_v27  ;;  %v369_v35 = vadd.f32 %v346_v32, %v319_v28  ;;  %v370_v36 = vadd.f32 %v346_v32, %v320_v29  ;;  %v371_v42 = vadd.f32 %v346_v32, %v321_v31  ;;  %v441_v63 = vpop.permute.xlu1 %440 }
  0xa4   : > { %v1580_v37 = vpop.eup %1579  ;;  %472 = vmatpush.msra.mxu0 %v1578_v33 }
  0xa5   : > { %v1582_v43 = vpop.eup %1581  ;;  %1589 = vtanh.f32 %v368_v34  ;;  %504 = vmatpush.msra.mxu1 %v1580_v37 }
  0xa6   : > { %v1584_v38 = vpop.eup %1583  ;;  %1591 = vtanh.f32 %v369_v35  ;;  %536 = vmatpush.msra.mxu2 %v1582_v43  ;;  %473 = vmatpush.msra.mxu0 %v1574_v26 }
  0xa7   : > { %v1586_v39 = vpop.eup %1585  ;;  %1593 = vtanh.f32 %v370_v36  ;;  %568 = vmatpush.msra.mxu3 %v1584_v38  ;;  %505 = vmatpush.msra.mxu1 %v1576_v30 }
  0xa8   : > { %v1588_v40 = vpop.eup %1587  ;;  %1595 = vtanh.f32 %v371_v42  ;;  %537 = vmatpush.msra.mxu2 %v1586_v39 }
  0xa9   : > { %569 = vmatpush.msra.mxu3 %v1588_v40 }
  0xaa   : > { %v431_v17 = vpop.permute.xlu0 %430 }
  0xab   : > { %v1590_v44 = vpop.eup %1589  ;;  %v426_v6 = vpop.permute.xlu1 %425 }
  0xac   : > { %v1592_v45 = vpop.eup %1591  ;;  %474 = vmatpush.msra.mxu0 %v1590_v44 }
  0xad   : > { %v1594_v46 = vpop.eup %1593  ;;  %506 = vmatpush.msra.mxu1 %v1592_v45  ;;  %1400 = vmatmul.msk.f32.vlgmr.msra.gmra.mxu0 %vm443_vm0, %v408_v41 }
  0xae   : > { %v1596_v47 = vpop.eup %1595  ;;  %538 = vmatpush.msra.mxu2 %v1594_v46  ;;  %1405 = vmatmul.msk.f32.vlgmr.msra.gmra.mxu1 %vm443_vm0, %v408_v41  ;;  %v1420_v46 = vld [vmem:[%s2308_s3 + $0x28] sm:$0xff] }
  0xaf   : > { %570 = vmatpush.msra.mxu3 %v1596_v47  ;;  %1410 = vmatmul.msk.f32.vlgmr.msra.gmra.mxu2 %vm443_vm0, %v408_v41 }
  0xb0   : > { %1415 = vmatmul.msk.f32.vlgmr.msra.gmra.mxu3 %vm443_vm0, %v408_v41 }
  0xb5   : > { %1401 = vmatmul.msk.f32.gmra.mxu0 %vm443_vm0, %v409_v48 }
  0xb6   : > { %1406 = vmatmul.msk.f32.gmra.mxu1 %vm443_vm0, %v409_v48 }
  0xb7   : > { %1411 = vmatmul.msk.f32.gmra.mxu2 %vm443_vm0, %v409_v48 }
  0xb8   : > { %1416 = vmatmul.msk.f32.gmra.mxu3 %vm443_vm0, %v409_v48 }
  0xbd   : > { %1402 = vmatmul.msk.f32.gmra.mxu0 %vm443_vm0, %v410_v49 }
  0xbe   : > { %1407 = vmatmul.msk.f32.gmra.mxu1 %vm443_vm0, %v410_v49 }
  0xbf   : > { %1412 = vmatmul.msk.f32.gmra.mxu2 %vm443_vm0, %v410_v49 }
  0xc0   : > { %1417 = vmatmul.msk.f32.gmra.mxu3 %vm443_vm0, %v410_v49 }
  0xc5   : > { %1403 = vmatmul.msk.f32.gmra.mxu0 %vm443_vm0, %v411_v50 }
  0xc6   : > { %1408 = vmatmul.msk.f32.gmra.mxu1 %vm443_vm0, %v411_v50 }
  0xc7   : > { %1413 = vmatmul.msk.f32.gmra.mxu2 %vm443_vm0, %v411_v50 }
  0xc8   : > { %1418 = vmatmul.msk.f32.gmra.mxu3 %vm443_vm0, %v411_v50 }
  0xcd   : > { %1404 = vmatmul.msk.f32.gmra.mxu0 %vm443_vm0, %v412_v51 }
  0xce   : > { %1409 = vmatmul.msk.f32.gmra.mxu1 %vm443_vm0, %v412_v51 }
  0xcf   : > { %1414 = vmatmul.msk.f32.gmra.mxu2 %vm443_vm0, %v412_v51 }
  0xd0   : > { %1419 = vmatmul.msk.f32.gmra.mxu3 %vm443_vm0, %v412_v51 }
 0x12a   : > { %v476_v52 = vpop.f32.mrf.mxu0 }
 0x12b   : > { %v508_v53 = vpop.f32.mrf.mxu1  ;;  %v477_v5 = vadd.f32 %v476_v52, %v421_v4 }
 0x12c   : > { %v509_v7 = vadd.f32 %v508_v53, %v421_v4 }
 0x12d   : > { %1597 = vtanh.f32 %v477_v5 }
 0x12e   : > { %1599 = vtanh.f32 %v509_v7  ;;  %v637_v7 = vpop.permute.xlu1 %636 }
 0x132   : > { %v2089_v54 = vpop.f32.mrf.mxu2  ;;  %v479_v55 = vpop.f32.mrf.mxu0 }
 0x133   : > { %v2091_v56 = vpop.f32.mrf.mxu3  ;;  %v511_v57 = vpop.f32.mrf.mxu1  ;;  %v480_v8 = vadd.f32 %v479_v55, %v426_v6  ;;  %v541_v38 = vadd.f32 %v2089_v54, %v421_v4  ;;  %v1421_v54 = vld [vmem:[%s2308_s3 + $0x30] sm:$0xff]  ;;  %v1422_v55 = vld [vmem:[%s2308_s3 + $0x38] sm:$0xff] }
 0x134   : > { %v512_v9 = vadd.f32 %v511_v57, %v426_v6  ;;  %v1598_v21 = vpop.eup %1597  ;;  %v573_v40 = vadd.f32 %v2091_v56, %v421_v4  ;;  %v1423_v56 = vld [vmem:[%s2308_s3 + $0x40] sm:$0xff]  ;;  %v1424_v57 = vld [vmem:[%s2308_s3 + $0x48] sm:$0xff] }
 0x135   : > { %1601 = vtanh.f32 %v480_v8  ;;  %v1600_v22 = vpop.eup %1599 }
 0x136   : > { %1603 = vtanh.f32 %v512_v9 }
 0x13a   : > { %v543_v58 = vpop.f32.mrf.mxu2  ;;  %v482_v59 = vpop.f32.mrf.mxu0 }
 0x13b   : > { %v575_v60 = vpop.f32.mrf.mxu3  ;;  %v514_v61 = vpop.f32.mrf.mxu1  ;;  %v483_v19 = vadd.f32 %v482_v59, %v431_v17  ;;  %v544_v36 = vadd.f32 %v543_v58, %v426_v6 }
 0x13c   : > { %v515_v20 = vadd.f32 %v514_v61, %v431_v17  ;;  %v1602_v24 = vpop.eup %1601  ;;  %v576_v42 = vadd.f32 %v575_v60, %v426_v6  ;;  %v642_v6 = vpop.permute.xlu0 %641 }
 0x13d   : > { %v1604_v28 = vpop.eup %1603 }
 0x142   : > { %v546_v0 = vpop.f32.mrf.mxu2  ;;  %v485_v1 = vpop.f32.mrf.mxu0 }
 0x143   : > { %v578_v2 = vpop.f32.mrf.mxu3  ;;  %v517_v3 = vpop.f32.mrf.mxu1  ;;  %v486_v16 = vadd.f32 %v485_v1, %v436_v62  ;;  %v547_v32 = vadd.f32 %v546_v0, %v431_v17 }
 0x144   : > { %v518_v18 = vadd.f32 %v517_v3, %v436_v62  ;;  %v579_v34 = vadd.f32 %v578_v2, %v431_v17  ;;  %v627_v17 = vpop.permute.xlu0 %626 }
 0x14a   : > { %v549_v10 = vpop.f32.mrf.mxu2  ;;  %v488_v11 = vpop.f32.mrf.mxu0 }
 0x14b   : > { %v581_v12 = vpop.f32.mrf.mxu3  ;;  %v489_v13 = vadd.f32 %v488_v11, %v441_v63  ;;  %v520_v14 = vpop.f32.mrf.mxu1  ;;  %v550_v25 = vadd.f32 %v549_v10, %v436_v62 }
 0x14c   : > { %v521_v15 = vadd.f32 %v520_v14, %v441_v63  ;;  %v582_v29 = vadd.f32 %v581_v12, %v436_v62 }
 0x14d   : > { %1605 = vtanh.f32 %v489_v13 }
 0x14e   : > { %1607 = vtanh.f32 %v521_v15  ;;  %v632_v15 = vpop.permute.xlu2 %631 }
 0x14f   : > { %1609 = vtanh.f32 %v486_v16 }
 0x150   : > { %1611 = vtanh.f32 %v518_v18 }
 0x151   : > { %1613 = vtanh.f32 %v483_v19 }
 0x152   : > { %v552_v23 = vpop.f32.mrf.mxu2  ;;  %1615 = vtanh.f32 %v515_v20 }
 0x153   : > { %v553_v26 = vadd.f32 %v552_v23, %v441_v63  ;;  %v584_v27 = vpop.f32.mrf.mxu3  ;;  %v1606_v31 = vpop.eup %1605 }
 0x154   : > { %v585_v30 = vadd.f32 %v584_v27, %v441_v63  ;;  %v1608_v33 = vpop.eup %1607  ;;  %670 = vmatpush.msrb.mxu0 %v1606_v31  ;;  %v622_v23 = vpop.permute.xlu1 %621 }
 0x155   : > { %1617 = vtanh.f32 %v553_v26  ;;  %v1610_v35 = vpop.eup %1609  ;;  %702 = vmatpush.msrb.mxu1 %v1608_v33 }
 0x156   : > { %1619 = vtanh.f32 %v585_v30  ;;  %v1612_v37 = vpop.eup %1611  ;;  %671 = vmatpush.msrb.mxu0 %v1610_v35 }
 0x157   : > { %1621 = vtanh.f32 %v550_v25  ;;  %v1614_v43 = vpop.eup %1613  ;;  %703 = vmatpush.msrb.mxu1 %v1612_v37 }
 0x158   : > { %1623 = vtanh.f32 %v582_v29  ;;  %v1616_v39 = vpop.eup %1615  ;;  %672 = vmatpush.msrb.mxu0 %v1614_v43 }
 0x159   : > { %1625 = vtanh.f32 %v547_v32  ;;  %704 = vmatpush.msrb.mxu1 %v1616_v39 }
 0x15a   : > { %1627 = vtanh.f32 %v579_v34  ;;  %673 = vmatpush.msrb.mxu0 %v1602_v24 }
 0x15b   : > { %v1618_v41 = vpop.eup %1617  ;;  %1629 = vtanh.f32 %v544_v36  ;;  %705 = vmatpush.msrb.mxu1 %v1604_v28 }
 0x15c   : > { %v1620_v44 = vpop.eup %1619  ;;  %1631 = vtanh.f32 %v576_v42  ;;  %734 = vmatpush.msrb.mxu2 %v1618_v41  ;;  %674 = vmatpush.msrb.mxu0 %v1598_v21  ;;  %v1450_v41 = vld [vmem:[%s2308_s3 + $0x50] sm:$0xff] }
 0x15d   : > { %v1622_v45 = vpop.eup %1621  ;;  %1633 = vtanh.f32 %v541_v38  ;;  %766 = vmatpush.msrb.mxu3 %v1620_v44  ;;  %706 = vmatpush.msrb.mxu1 %v1600_v22 }
 0x15e   : > { %v1624_v47 = vpop.eup %1623  ;;  %1635 = vtanh.f32 %v573_v40  ;;  %735 = vmatpush.msrb.mxu2 %v1622_v45  ;;  %1430 = vmatmul.msk.f32.vlgmr.msrb.gmra.mxu0 %vm443_vm0, %v1420_v46 }
 0x15f   : > { %v1626_v48 = vpop.eup %1625  ;;  %767 = vmatpush.msrb.mxu3 %v1624_v47  ;;  %1435 = vmatmul.msk.f32.vlgmr.msrb.gmra.mxu1 %vm443_vm0, %v1420_v46 }
 0x160   : > { %v1628_v49 = vpop.eup %1627  ;;  %736 = vmatpush.msrb.mxu2 %v1626_v48 }
 0x161   : > { %v1630_v50 = vpop.eup %1629  ;;  %768 = vmatpush.msrb.mxu3 %v1628_v49 }
 0x162   : > { %v1632_v51 = vpop.eup %1631  ;;  %737 = vmatpush.msrb.mxu2 %v1630_v50 }
 0x163   : > { %v1634_v52 = vpop.eup %1633  ;;  %769 = vmatpush.msrb.mxu3 %v1632_v51 }
 0x164   : > { %v1636_v53 = vpop.eup %1635  ;;  %738 = vmatpush.msrb.mxu2 %v1634_v52 }
 0x165   : > { %770 = vmatpush.msrb.mxu3 %v1636_v53  ;;  %1440 = vmatmul.msk.f32.vlgmr.msrb.gmra.mxu2 %vm443_vm0, %v1420_v46 }
 0x166   : > { %1445 = vmatmul.msk.f32.vlgmr.msrb.gmra.mxu3 %vm443_vm0, %v1420_v46  ;;  %1431 = vmatmul.msk.f32.gmra.mxu0 %vm443_vm0, %v1421_v54 }
 0x167   : > { %1436 = vmatmul.msk.f32.gmra.mxu1 %vm443_vm0, %v1421_v54 }
 0x16d   : > { %1441 = vmatmul.msk.f32.gmra.mxu2 %vm443_vm0, %v1421_v54 }
 0x16e   : > { %1446 = vmatmul.msk.f32.gmra.mxu3 %vm443_vm0, %v1421_v54  ;;  %1432 = vmatmul.msk.f32.gmra.mxu0 %vm443_vm0, %v1422_v55  ;;  %v1451_v54 = vld [vmem:[%s2308_s3 + $0x58] sm:$0xff] }
 0x16f   : > { %1437 = vmatmul.msk.f32.gmra.mxu1 %vm443_vm0, %v1422_v55 }
 0x175   : > { %1442 = vmatmul.msk.f32.gmra.mxu2 %vm443_vm0, %v1422_v55 }
 0x176   : > { %1447 = vmatmul.msk.f32.gmra.mxu3 %vm443_vm0, %v1422_v55  ;;  %1433 = vmatmul.msk.f32.gmra.mxu0 %vm443_vm0, %v1423_v56 }
 0x177   : > { %1438 = vmatmul.msk.f32.gmra.mxu1 %vm443_vm0, %v1423_v56 }
 0x17d   : > { %1443 = vmatmul.msk.f32.gmra.mxu2 %vm443_vm0, %v1423_v56 }
 0x17e   : > { %1448 = vmatmul.msk.f32.gmra.mxu3 %vm443_vm0, %v1423_v56  ;;  %1434 = vmatmul.msk.f32.gmra.mxu0 %vm443_vm0, %v1424_v57 }
 0x17f   : > { %1439 = vmatmul.msk.f32.gmra.mxu1 %vm443_vm0, %v1424_v57 }
 0x185   : > { %1444 = vmatmul.msk.f32.gmra.mxu2 %vm443_vm0, %v1424_v57 }
 0x186   : > { %1449 = vmatmul.msk.f32.gmra.mxu3 %vm443_vm0, %v1424_v57 }
 0x1db   : > { %v676_v58 = vpop.f32.mrf.mxu0 }
 0x1dc   : > { %v708_v59 = vpop.f32.mrf.mxu1  ;;  %v677_v25 = vadd.f32 %v676_v58, %v622_v23 }
 0x1dd   : > { %v709_v26 = vadd.f32 %v708_v59, %v622_v23 }
 0x1e3   : > { %v679_v60 = vpop.f32.mrf.mxu0 }
 0x1e4   : > { %v711_v61 = vpop.f32.mrf.mxu1  ;;  %v680_v22 = vadd.f32 %v679_v60, %v627_v17 }
 0x1e5   : > { %v712_v24 = vadd.f32 %v711_v61, %v627_v17  ;;  %v1452_v61 = vld [vmem:[%s2308_s3 + $0x60] sm:$0xff] }
 0x1e8   : > { %v2130_v62 = vpop.f32.mrf.mxu2 }
 0x1e9   : > { %v2132_v63 = vpop.f32.mrf.mxu3  ;;  %v741_v48 = vadd.f32 %v2130_v62, %v622_v23  ;;  %v1453_v62 = vld [vmem:[%s2308_s3 + $0x68] sm:$0xff] }
 0x1ea   : > { %v773_v49 = vadd.f32 %v2132_v63, %v622_v23  ;;  %v1454_v63 = vld [vmem:[%s2308_s3 + $0x70] sm:$0xff] }
 0x1eb   : > { %v682_v0 = vpop.f32.mrf.mxu0 }
 0x1ec   : > { %v714_v1 = vpop.f32.mrf.mxu1  ;;  %v683_v18 = vadd.f32 %v682_v0, %v632_v15 }
 0x1ed   : > { %v715_v19 = vadd.f32 %v714_v1, %v632_v15 }
 0x1f0   : > { %v743_v2 = vpop.f32.mrf.mxu2 }
 0x1f1   : > { %v2134_v3 = vpop.f32.mrf.mxu3  ;;  %v744_v45 = vadd.f32 %v743_v2, %v627_v17 }
 0x1f2   : > { %v776_v47 = vadd.f32 %v2134_v3, %v627_v17 }
 0x1f3   : > { %v685_v4 = vpop.f32.mrf.mxu0 }
 0x1f4   : > { %v717_v5 = vpop.f32.mrf.mxu1  ;;  %v686_v12 = vadd.f32 %v685_v4, %v637_v7 }
 0x1f5   : > { %v718_v16 = vadd.f32 %v717_v5, %v637_v7 }
 0x1f8   : > { %v746_v8 = vpop.f32.mrf.mxu2 }
 0x1f9   : > { %v778_v9 = vpop.f32.mrf.mxu3  ;;  %v747_v38 = vadd.f32 %v746_v8, %v632_v15 }
 0x1fa   : > { %v779_v40 = vadd.f32 %v778_v9, %v632_v15 }
 0x1fb   : > { %v688_v10 = vpop.f32.mrf.mxu0 }
 0x1fc   : > { %v720_v11 = vpop.f32.mrf.mxu1  ;;  %v689_v13 = vadd.f32 %v688_v10, %v642_v6  ;;  %v842_v10 = vpop.permute.xlu2 %841 }
 0x1fd   : > { %v721_v14 = vadd.f32 %v720_v11, %v642_v6 }
 0x1fe   : > { %1637 = vtanh.f32 %v689_v13  ;;  %v837_v13 = vpop.permute.xlu0 %836 }
 0x1ff   : > { %1639 = vtanh.f32 %v721_v14 }
 0x200   : > { %v749_v20 = vpop.f32.mrf.mxu2  ;;  %1641 = vtanh.f32 %v686_v12 }
 0x201   : > { %v781_v21 = vpop.f32.mrf.mxu3  ;;  %1643 = vtanh.f32 %v718_v16  ;;  %v750_v34 = vadd.f32 %v749_v20, %v637_v7 }
 0x202   : > { %1645 = vtanh.f32 %v683_v18  ;;  %v782_v42 = vadd.f32 %v781_v21, %v637_v7  ;;  %v832_v18 = vpop.permute.xlu1 %831 }
 0x203   : > { %1647 = vtanh.f32 %v715_v19 }
 0x204   : > { %v1638_v27 = vpop.eup %1637  ;;  %1649 = vtanh.f32 %v680_v22 }
 0x205   : > { %v1640_v28 = vpop.eup %1639  ;;  %1651 = vtanh.f32 %v712_v24  ;;  %870 = vmatpush.msra.mxu0 %v1638_v27  ;;  %v827_v24 = vpop.permute.xlu2 %826 }
 0x206   : > { %v1642_v29 = vpop.eup %1641  ;;  %1653 = vtanh.f32 %v677_v25  ;;  %902 = vmatpush.msra.mxu1 %v1640_v28  ;;  %v822_v27 = vpop.permute.xlu0 %821 }
 0x207   : > { %v1644_v30 = vpop.eup %1643  ;;  %1655 = vtanh.f32 %v709_v26  ;;  %871 = vmatpush.msra.mxu0 %v1642_v29 }
 0x208   : > { %v752_v31 = vpop.f32.mrf.mxu2  ;;  %v1646_v33 = vpop.eup %1645  ;;  %903 = vmatpush.msra.mxu1 %v1644_v30 }
 0x209   : > { %v784_v32 = vpop.f32.mrf.mxu3  ;;  %v753_v35 = vadd.f32 %v752_v31, %v642_v6  ;;  %v1648_v37 = vpop.eup %1647  ;;  %872 = vmatpush.msra.mxu0 %v1646_v33 }
 0x20a   : > { %v785_v36 = vadd.f32 %v784_v32, %v642_v6  ;;  %v1650_v43 = vpop.eup %1649  ;;  %904 = vmatpush.msra.mxu1 %v1648_v37 }
 0x20b   : > { %1657 = vtanh.f32 %v753_v35  ;;  %v1652_v39 = vpop.eup %1651  ;;  %873 = vmatpush.msra.mxu0 %v1650_v43 }
 0x20c   : > { %1659 = vtanh.f32 %v785_v36  ;;  %v1654_v44 = vpop.eup %1653  ;;  %905 = vmatpush.msra.mxu1 %v1652_v39  ;;  %v1480_v39 = vld [vmem:[%s2308_s3 + $0x78] sm:$0xff] }
 0x20d   : > { %1661 = vtanh.f32 %v750_v34  ;;  %v1656_v46 = vpop.eup %1655  ;;  %874 = vmatpush.msra.mxu0 %v1654_v44 }
 0x20e   : > { %1663 = vtanh.f32 %v782_v42  ;;  %906 = vmatpush.msra.mxu1 %v1656_v46  ;;  %1460 = vmatmul.msk.f32.vlgmr.msra.gmra.mxu0 %vm443_vm0, %v1450_v41 }
 0x20f   : > { %1665 = vtanh.f32 %v747_v38  ;;  %1465 = vmatmul.msk.f32.vlgmr.msra.gmra.mxu1 %vm443_vm0, %v1450_v41 }
 0x210   : > { %1667 = vtanh.f32 %v779_v40 }
 0x211   : > { %v1658_v50 = vpop.eup %1657  ;;  %1669 = vtanh.f32 %v744_v45 }
 0x212   : > { %v1660_v51 = vpop.eup %1659  ;;  %1671 = vtanh.f32 %v776_v47  ;;  %934 = vmatpush.msra.mxu2 %v1658_v50 }
 0x213   : > { %v1662_v52 = vpop.eup %1661  ;;  %1673 = vtanh.f32 %v741_v48  ;;  %966 = vmatpush.msra.mxu3 %v1660_v51 }
 0x214   : > { %v1664_v53 = vpop.eup %1663  ;;  %1675 = vtanh.f32 %v773_v49  ;;  %935 = vmatpush.msra.mxu2 %v1662_v52 }
 0x215   : > { %v1666_v55 = vpop.eup %1665  ;;  %967 = vmatpush.msra.mxu3 %v1664_v53 }
 0x216   : > { %v1668_v56 = vpop.eup %1667  ;;  %936 = vmatpush.msra.mxu2 %v1666_v55  ;;  %1461 = vmatmul.msk.f32.gmra.mxu0 %vm443_vm0, %v1451_v54 }
 0x217   : > { %v1670_v57 = vpop.eup %1669  ;;  %968 = vmatpush.msra.mxu3 %v1668_v56  ;;  %1466 = vmatmul.msk.f32.gmra.mxu1 %vm443_vm0, %v1451_v54 }
 0x218   : > { %v1672_v58 = vpop.eup %1671  ;;  %937 = vmatpush.msra.mxu2 %v1670_v57 }
 0x219   : > { %v1674_v59 = vpop.eup %1673  ;;  %969 = vmatpush.msra.mxu3 %v1672_v58 }
 0x21a   : > { %v1676_v60 = vpop.eup %1675  ;;  %938 = vmatpush.msra.mxu2 %v1674_v59 }
 0x21b   : > { %970 = vmatpush.msra.mxu3 %v1676_v60  ;;  %1470 = vmatmul.msk.f32.vlgmr.msra.gmra.mxu2 %vm443_vm0, %v1450_v41 }
 0x21c   : > { %1475 = vmatmul.msk.f32.vlgmr.msra.gmra.mxu3 %vm443_vm0, %v1450_v41 }
 0x21e   : > { %1462 = vmatmul.msk.f32.gmra.mxu0 %vm443_vm0, %v1452_v61 }
 0x21f   : > { %1467 = vmatmul.msk.f32.gmra.mxu1 %vm443_vm0, %v1452_v61 }
 0x223   : > { %1471 = vmatmul.msk.f32.gmra.mxu2 %vm443_vm0, %v1451_v54 }
 0x224   : > { %1476 = vmatmul.msk.f32.gmra.mxu3 %vm443_vm0, %v1451_v54  ;;  %v1481_v54 = vld [vmem:[%s2308_s3 + $0x80] sm:$0xff] }
 0x226   : > { %1463 = vmatmul.msk.f32.gmra.mxu0 %vm443_vm0, %v1453_v62 }
 0x227   : > { %1468 = vmatmul.msk.f32.gmra.mxu1 %vm443_vm0, %v1453_v62 }
 0x22b   : > { %1472 = vmatmul.msk.f32.gmra.mxu2 %vm443_vm0, %v1452_v61 }
 0x22c   : > { %1477 = vmatmul.msk.f32.gmra.mxu3 %vm443_vm0, %v1452_v61 }
 0x22e   : > { %1464 = vmatmul.msk.f32.gmra.mxu0 %vm443_vm0, %v1454_v63 }
 0x22f   : > { %1469 = vmatmul.msk.f32.gmra.mxu1 %vm443_vm0, %v1454_v63 }
 0x233   : > { %1473 = vmatmul.msk.f32.gmra.mxu2 %vm443_vm0, %v1453_v62 }
 0x234   : > { %1478 = vmatmul.msk.f32.gmra.mxu3 %vm443_vm0, %v1453_v62 }
 0x23b   : > { %1474 = vmatmul.msk.f32.gmra.mxu2 %vm443_vm0, %v1454_v63 }
 0x23c   : > { %1479 = vmatmul.msk.f32.gmra.mxu3 %vm443_vm0, %v1454_v63  ;;  %v1482_v63 = vld [vmem:[%s2308_s3 + $0x88] sm:$0xff] }
 0x28b   : > { %v876_v0 = vpop.f32.mrf.mxu0 }
 0x28c   : > { %v908_v1 = vpop.f32.mrf.mxu1  ;;  %v877_v29 = vadd.f32 %v876_v0, %v822_v27 }
 0x28d   : > { %v909_v30 = vadd.f32 %v908_v1, %v822_v27 }
 0x293   : > { %v879_v2 = vpop.f32.mrf.mxu0 }
 0x294   : > { %v911_v3 = vpop.f32.mrf.mxu1  ;;  %v880_v26 = vadd.f32 %v879_v2, %v827_v24 }
 0x295   : > { %v912_v28 = vadd.f32 %v911_v3, %v827_v24 }
 0x29b   : > { %v882_v4 = vpop.f32.mrf.mxu0 }
 0x29c   : > { %v914_v5 = vpop.f32.mrf.mxu1  ;;  %v883_v22 = vadd.f32 %v882_v4, %v832_v18  ;;  %v1483_v4 = vld [vmem:[%s2308_s3 + $0x90] sm:$0xff] }
 0x29d   : > { %v915_v25 = vadd.f32 %v914_v5, %v832_v18  ;;  %v1484_v5 = vld [vmem:[%s2308_s3 + $0x98] sm:$0xff] }
 0x29e   : > { %v2174_v6 = vpop.f32.mrf.mxu2 }
 0x29f   : > { %v2176_v7 = vpop.f32.mrf.mxu3  ;;  %v941_v55 = vadd.f32 %v2174_v6, %v822_v27 }
 0x2a0   : > { %v973_v56 = vadd.f32 %v2176_v7, %v822_v27 }
 0x2a3   : > { %v885_v8 = vpop.f32.mrf.mxu0 }
 0x2a4   : > { %v917_v9 = vpop.f32.mrf.mxu1  ;;  %v886_v15 = vadd.f32 %v885_v8, %v837_v13 }
 0x2a5   : > { %v918_v19 = vadd.f32 %v917_v9, %v837_v13 }
 0x2a6   : > { %v2178_v11 = vpop.f32.mrf.mxu2 }
 0x2a7   : > { %v2180_v12 = vpop.f32.mrf.mxu3  ;;  %v944_v52 = vadd.f32 %v2178_v11, %v827_v24 }
 0x2a8   : > { %v976_v53 = vadd.f32 %v2180_v12, %v827_v24 }
 0x2ab   : > { %v888_v14 = vpop.f32.mrf.mxu0 }
 0x2ac   : > { %v889_v16 = vadd.f32 %v888_v14, %v842_v10  ;;  %v920_v17 = vpop.f32.mrf.mxu1  ;;  %v2221_v14 = vpop.permute.xlu0 %1031 }
 0x2ad   : > { %v921_v20 = vadd.f32 %v920_v17, %v842_v10 }
 0x2ae   : > { %v946_v21 = vpop.f32.mrf.mxu2  ;;  %1677 = vtanh.f32 %v889_v16 }
 0x2af   : > { %v978_v23 = vpop.f32.mrf.mxu3  ;;  %1679 = vtanh.f32 %v921_v20  ;;  %v947_v50 = vadd.f32 %v946_v21, %v832_v18 }
 0x2b0   : > { %1681 = vtanh.f32 %v886_v15  ;;  %v979_v51 = vadd.f32 %v978_v23, %v832_v18 }
 0x2b1   : > { %1683 = vtanh.f32 %v918_v19 }
 0x2b2   : > { %1685 = vtanh.f32 %v883_v22 }
 0x2b3   : > { %1687 = vtanh.f32 %v915_v25 }
 0x2b4   : > { %v1678_v31 = vpop.eup %1677  ;;  %1689 = vtanh.f32 %v880_v26 }
 0x2b5   : > { %v1680_v32 = vpop.eup %1679  ;;  %1691 = vtanh.f32 %v912_v28  ;;  %1070 = vmatpush.msrb.mxu0 %v1678_v31 }
 0x2b6   : > { %v949_v33 = vpop.f32.mrf.mxu2  ;;  %v1682_v34 = vpop.eup %1681  ;;  %1693 = vtanh.f32 %v877_v29  ;;  %1102 = vmatpush.msrb.mxu1 %v1680_v32 }
 0x2b7   : > { %v981_v35 = vpop.f32.mrf.mxu3  ;;  %v1684_v36 = vpop.eup %1683  ;;  %1695 = vtanh.f32 %v909_v30  ;;  %1071 = vmatpush.msrb.mxu0 %v1682_v34  ;;  %v950_v45 = vadd.f32 %v949_v33, %v837_v13 }
 0x2b8   : > { %v1686_v37 = vpop.eup %1685  ;;  %1103 = vmatpush.msrb.mxu1 %v1684_v36  ;;  %v982_v48 = vadd.f32 %v981_v35, %v837_v13  ;;  %v1027_v13 = vpop.permute.xlu2 %1026 }
 0x2b9   : > { %v1688_v42 = vpop.eup %1687  ;;  %1072 = vmatpush.msrb.mxu0 %v1686_v37  ;;  %v2229_v29 = vpop.permute.xlu0 %1214 }
 0x2ba   : > { %v1690_v43 = vpop.eup %1689  ;;  %1104 = vmatpush.msrb.mxu1 %v1688_v42 }
 0x2bb   : > { %v1692_v38 = vpop.eup %1691  ;;  %1073 = vmatpush.msrb.mxu0 %v1690_v43 }
 0x2bc   : > { %v1694_v40 = vpop.eup %1693  ;;  %1105 = vmatpush.msrb.mxu1 %v1692_v38 }
 0x2bd   : > { %v1696_v41 = vpop.eup %1695  ;;  %1074 = vmatpush.msrb.mxu0 %v1694_v40 }
 0x2be   : > { %v952_v44 = vpop.f32.mrf.mxu2  ;;  %1106 = vmatpush.msrb.mxu1 %v1696_v41  ;;  %1490 = vmatmul.msk.f32.vlgmr.msrb.gmra.mxu0 %vm443_vm0, %v1480_v39 }
 0x2bf   : > { %v953_v46 = vadd.f32 %v952_v44, %v842_v10  ;;  %v984_v47 = vpop.f32.mrf.mxu3  ;;  %1495 = vmatmul.msk.f32.vlgmr.msrb.gmra.mxu1 %vm443_vm0, %v1480_v39 }
 0x2c0   : > { %v985_v49 = vadd.f32 %v984_v47, %v842_v10  ;;  %v1022_v10 = vpop.permute.xlu1 %1021  ;;  %v2226_v23 = vpop.permute.xlu2 %1041 }
 0x2c1   : > { %1697 = vtanh.f32 %v953_v46 }
 0x2c2   : > { %1699 = vtanh.f32 %v985_v49 }
 0x2c3   : > { %1701 = vtanh.f32 %v950_v45 }
 0x2c4   : > { %1703 = vtanh.f32 %v982_v48 }
 0x2c5   : > { %1705 = vtanh.f32 %v947_v50  ;;  %v2242_v50 = vpop.permute.xlu0 %1229 }
 0x2c6   : > { %1707 = vtanh.f32 %v979_v51  ;;  %1491 = vmatmul.msk.f32.gmra.mxu0 %vm443_vm0, %v1481_v54 }
 0x2c7   : > { %v1698_v57 = vpop.eup %1697  ;;  %1709 = vtanh.f32 %v944_v52  ;;  %1496 = vmatmul.msk.f32.gmra.mxu1 %vm443_vm0, %v1481_v54 }
 0x2c8   : > { %v1700_v58 = vpop.eup %1699  ;;  %1711 = vtanh.f32 %v976_v53  ;;  %1134 = vmatpush.msrb.mxu2 %v1698_v57  ;;  %v2223_v18 = vpop.permute.xlu1 %1036 }
 0x2c9   : > { %v1702_v59 = vpop.eup %1701  ;;  %1713 = vtanh.f32 %v941_v55  ;;  %1166 = vmatpush.msrb.mxu3 %v1700_v58  ;;  %v2238_v44 = vpop.permute.xlu2 %1224 }
 0x2ca   : > { %v1704_v60 = vpop.eup %1703  ;;  %1715 = vtanh.f32 %v973_v56  ;;  %1135 = vmatpush.msrb.mxu2 %v1702_v59 }
 0x2cb   : > { %v1706_v61 = vpop.eup %1705  ;;  %1167 = vmatpush.msrb.mxu3 %v1704_v60 }
 0x2cc   : > { %v1708_v62 = vpop.eup %1707  ;;  %1136 = vmatpush.msrb.mxu2 %v1706_v61 }
 0x2cd   : > { %v1710_v0 = vpop.eup %1709  ;;  %1168 = vmatpush.msrb.mxu3 %v1708_v62 }
 0x2ce   : > { %v1712_v1 = vpop.eup %1711  ;;  %1137 = vmatpush.msrb.mxu2 %v1710_v0  ;;  %1492 = vmatmul.msk.f32.gmra.mxu0 %vm443_vm0, %v1482_v63 }
 0x2cf   : > { %v1714_v2 = vpop.eup %1713  ;;  %1169 = vmatpush.msrb.mxu3 %v1712_v1  ;;  %1497 = vmatmul.msk.f32.gmra.mxu1 %vm443_vm0, %v1482_v63 }
 0x2d0   : > { %v1716_v3 = vpop.eup %1715  ;;  %1138 = vmatpush.msrb.mxu2 %v1714_v2  ;;  %v2232_v32 = vpop.permute.xlu1 %1219 }
 0x2d1   : > { %1170 = vmatpush.msrb.mxu3 %v1716_v3  ;;  %1500 = vmatmul.msk.f32.vlgmr.msrb.gmra.mxu2 %vm443_vm0, %v1480_v39 }
 0x2d2   : > { %1505 = vmatmul.msk.f32.vlgmr.msrb.gmra.mxu3 %vm443_vm0, %v1480_v39 }
 0x2d6   : > { %1493 = vmatmul.msk.f32.gmra.mxu0 %vm443_vm0, %v1483_v4 }
 0x2d7   : > { %1498 = vmatmul.msk.f32.gmra.mxu1 %vm443_vm0, %v1483_v4 }
 0x2d8   : > { %v2245_v57 = vpop.permute.xlu1 %1234 }
 0x2d9   : > { %1501 = vmatmul.msk.f32.gmra.mxu2 %vm443_vm0, %v1481_v54 }
 0x2da   : > { %1506 = vmatmul.msk.f32.gmra.mxu3 %vm443_vm0, %v1481_v54 }
 0x2de   : > { %1494 = vmatmul.msk.f32.gmra.mxu0 %vm443_vm0, %v1484_v5 }
 0x2df   : > { %1499 = vmatmul.msk.f32.gmra.mxu1 %vm443_vm0, %v1484_v5 }
 0x2e1   : > { %1502 = vmatmul.msk.f32.gmra.mxu2 %vm443_vm0, %v1482_v63 }
 0x2e2   : > { %1507 = vmatmul.msk.f32.gmra.mxu3 %vm443_vm0, %v1482_v63 }
 0x2e9   : > { %1503 = vmatmul.msk.f32.gmra.mxu2 %vm443_vm0, %v1483_v4 }
 0x2ea   : > { %1508 = vmatmul.msk.f32.gmra.mxu3 %vm443_vm0, %v1483_v4 }
 0x2f1   : > { %1504 = vmatmul.msk.f32.gmra.mxu2 %vm443_vm0, %v1484_v5 }
 0x2f2   : > { %1509 = vmatmul.msk.f32.gmra.mxu3 %vm443_vm0, %v1484_v5 }
 0x33b   : > { %v1076_v6 = vpop.f32.mrf.mxu0 }
 0x33c   : > { %v1108_v7 = vpop.f32.mrf.mxu1  ;;  %v1077_v31 = vadd.f32 %v1076_v6, %v1022_v10 }
 0x33d   : > { %v1109_v21 = vadd.f32 %v1108_v7, %v1022_v10 }
 0x343   : > { %v1079_v8 = vpop.f32.mrf.mxu0 }
 0x344   : > { %v1111_v9 = vpop.f32.mrf.mxu1  ;;  %v1080_v26 = vadd.f32 %v1079_v8, %v1027_v13 }
 0x345   : > { %v1112_v20 = vadd.f32 %v1111_v9, %v1027_v13 }
 0x347   : > { %1717 = vtanh.f32 %v1112_v20 }
 0x348   : > { %1719 = vtanh.f32 %v1109_v21 }
 0x34b   : > { %v1082_v11 = vpop.f32.mrf.mxu0 }
 0x34c   : > { %v1114_v12 = vpop.f32.mrf.mxu1  ;;  %v1083_v33 = vadd.f32 %v1082_v11, %v2221_v14 }
 0x34d   : > { %v1115_v22 = vadd.f32 %v1114_v12, %v2221_v14  ;;  %v1718_v35 = vpop.eup %1717 }
 0x34e   : > { %v1720_v37 = vpop.eup %1719  ;;  %v1242_v39 = vmul.f32 %v1718_v35, %v2232_v32 }
 0x34f   : > { %1721 = vtanh.f32 %v1115_v22  ;;  %v1238_v46 = vmul.f32 %v1720_v37, %v2229_v29 }
 0x351   : > { %v1267_v53 = vadd.f32 %v1242_v39, %v1238_v46 }
 0x353   : > { %v1085_v19 = vpop.f32.mrf.mxu0 }
 0x354   : > { %v1140_v15 = vpop.f32.mrf.mxu2  ;;  %v1117_v16 = vpop.f32.mrf.mxu1  ;;  %v1086_v36 = vadd.f32 %v1085_v19, %v2223_v18 }
 0x355   : > { %v1172_v17 = vpop.f32.mrf.mxu3  ;;  %v1118_v24 = vadd.f32 %v1117_v16, %v2223_v18  ;;  %v1722_v42 = vpop.eup %1721  ;;  %v1141_v48 = vadd.f32 %v1140_v15, %v1022_v10 }
 0x356   : > { %v1246_v47 = vmul.f32 %v1722_v42, %v2238_v44  ;;  %v1173_v51 = vadd.f32 %v1172_v17, %v1022_v10 }
 0x357   : > { %1723 = vtanh.f32 %v1118_v24 }
 0x358   : > { %1725 = vtanh.f32 %v1080_v26  ;;  %v1268_v60 = vadd.f32 %v1267_v53, %v1246_v47 }
 0x35b   : > { %v1088_v34 = vpop.f32.mrf.mxu0 }
 0x35c   : > { %v1143_v25 = vpop.f32.mrf.mxu2  ;;  %v1120_v27 = vpop.f32.mrf.mxu1  ;;  %v1089_v43 = vadd.f32 %v1088_v34, %v2226_v23 }
 0x35d   : > { %v1175_v28 = vpop.f32.mrf.mxu3  ;;  %v1121_v30 = vadd.f32 %v1120_v27, %v2226_v23  ;;  %v1724_v41 = vpop.eup %1723  ;;  %v1144_v55 = vadd.f32 %v1143_v25, %v1027_v13 }
 0x35e   : > { %v1726_v45 = vpop.eup %1725  ;;  %v1250_v54 = vmul.f32 %v1724_v41, %v2242_v50  ;;  %v1176_v59 = vadd.f32 %v1175_v28, %v1027_v13 }
 0x35f   : > { %1727 = vtanh.f32 %v1121_v30  ;;  %v1241_v58 = vmul.f32 %v1726_v45, %v2232_v32 }
 0x360   : > { %1729 = vtanh.f32 %v1077_v31  ;;  %v1269_v4 = vadd.f32 %v1268_v60, %v1250_v54 }
 0x361   : > { %1731 = vtanh.f32 %v1083_v33 }
 0x362   : > { %1733 = vtanh.f32 %v1086_v36 }
 0x363   : > { %1735 = vtanh.f32 %v1089_v43 }
 0x364   : > { %v1146_v38 = vpop.f32.mrf.mxu2  ;;  %1737 = vtanh.f32 %v1141_v48 }
 0x365   : > { %v1178_v40 = vpop.f32.mrf.mxu3  ;;  %v1728_v49 = vpop.eup %1727  ;;  %v1147_v62 = vadd.f32 %v1146_v38, %v2221_v14  ;;  %1739 = vtanh.f32 %v1173_v51 }
 0x366   : > { %v1730_v52 = vpop.eup %1729  ;;  %v1254_v61 = vmul.f32 %v1728_v49, %v2245_v57  ;;  %v1179_v1 = vadd.f32 %v1178_v40, %v2221_v14  ;;  %1741 = vtanh.f32 %v1144_v55 }
 0x367   : > { %v1732_v56 = vpop.eup %1731  ;;  %v1237_v0 = vmul.f32 %v1730_v52, %v2229_v29  ;;  %1743 = vtanh.f32 %v1176_v59 }
 0x368   : > { %v1734_v63 = vpop.eup %1733  ;;  %v1245_v3 = vmul.f32 %v1732_v56, %v2238_v44  ;;  %v1270_v11 = vadd.f32 %v1269_v4, %v1254_v61  ;;  %1745 = vtanh.f32 %v1147_v62 }
 0x369   : > { %v1736_v7 = vpop.eup %1735  ;;  %v1257_v9 = vadd.f32 %v1241_v58, %v1237_v0  ;;  %v1249_v10 = vmul.f32 %v1734_v63, %v2242_v50  ;;  %1747 = vtanh.f32 %v1179_v1 }
 0x36a   : > { %v1738_v12 = vpop.eup %1737  ;;  %v1253_v14 = vmul.f32 %v1736_v7, %v2245_v57  ;;  %v1271_v19 = vrot.slane %v1270_v11, 4 }
 0x36b   : > { %v1258_v13 = vadd.f32 %v1257_v9, %v1245_v3  ;;  %v1740_v15 = vpop.eup %1739  ;;  %v1239_v35 = vmul.f32 %v1738_v12, %v2229_v29 }
 0x36c   : > { %v1149_v2 = vpop.f32.mrf.mxu2  ;;  %v1742_v16 = vpop.eup %1741  ;;  %v1272_v31 = vadd.f32 %v1271_v19, %v1270_v11  ;;  %v1240_v37 = vmul.f32 %v1740_v15, %v2229_v29  ;;  %v1317_v11 = vlaneseq }
 0x36d   : > { %v1150_v5 = vadd.f32 %v1149_v2, %v2223_v18  ;;  %v1181_v6 = vpop.f32.mrf.mxu3  ;;  %v1259_v17 = vadd.f32 %v1258_v13, %v1249_v10  ;;  %v1744_v20 = vpop.eup %1743  ;;  %v1243_v27 = vmul.f32 %v1742_v16, %v2232_v32  ;;  %v1298_v2 = vstv %s1297_s23 }
 0x36e   : > { %v1182_v8 = vadd.f32 %v1181_v6, %v2223_v18  ;;  %v1746_v22 = vpop.eup %1745  ;;  %v1244_v33 = vmul.f32 %v1744_v20, %v2232_v32  ;;  %vm1319_vm4 = vcmp.lt.s32.totalorder %v1317_v11, 512 }
 0x36f   : > { %1749 = vtanh.f32 %v1150_v5  ;;  %v1260_v18 = vadd.f32 %v1259_v17, %v1253_v14  ;;  %v1748_v26 = vpop.eup %1747  ;;  %v1247_v36 = vmul.f32 %v1746_v22, %v2238_v44  ;;  %v1277_v38 = vadd.f32 %v1243_v27, %v1239_v35 }
 0x370   : > { %1751 = vtanh.f32 %v1182_v8  ;;  %v1248_v43 = vmul.f32 %v1748_v26, %v2238_v44  ;;  %v1287_v40 = vadd.f32 %v1244_v33, %v1240_v37 }
 0x371   : > { %v1261_v42 = vrot.slane %v1260_v18, 4  ;;  %v1278_v32 = vadd.f32 %v1277_v38, %v1247_v36 }
 0x372   : > { %v1288_v47 = vadd.f32 %v1287_v40, %v1248_v43 }
 0x373   : > { %v1262_v46 = vadd.f32 %v1261_v42, %v1260_v18 }
 0x374   : > { %v1152_v21 = vpop.f32.mrf.mxu2 }
 0x375   : > { %v1153_v24 = vadd.f32 %v1152_v21, %v2226_v23  ;;  %v1184_v25 = vpop.f32.mrf.mxu3  ;;  %v1750_v30 = vpop.eup %1749  ;;  %v1263_v54 = vrot.slane %v1262_v46, 2 }
 0x376   : > { %v1185_v28 = vadd.f32 %v1184_v25, %v2226_v23  ;;  %v1752_v34 = vpop.eup %1751  ;;  %v1251_v39 = vmul.f32 %v1750_v30, %v2242_v50  ;;  %v1273_v23 = vrot.slane %v1272_v31, 2 }
 0x377   : > { %1753 = vtanh.f32 %v1153_v24  ;;  %v1252_v41 = vmul.f32 %v1752_v34, %v2242_v50  ;;  %v1264_v60 = vadd.f32 %v1263_v54, %v1262_v46 }
 0x378   : > { %1755 = vtanh.f32 %v1185_v28  ;;  %v1279_v49 = vadd.f32 %v1278_v32, %v1251_v39  ;;  %v1274_v29 = vadd.f32 %v1273_v23, %v1272_v31 }
 0x379   : > { %v1289_v52 = vadd.f32 %v1288_v47, %v1252_v41  ;;  %v1265_v3 = vrot.slane %v1264_v60, 1 }
 0x37a   : > { %v1275_v50 = vrot.slane %v1274_v29, 1 }
 0x37b   : > { %v1266_v8 = vadd.f32 %v1265_v3, %v1264_v60 }
 0x37c   : > { %v1276_v0 = vadd.f32 %v1275_v50, %v1274_v29 }
 0x37d   : > { %v1754_v45 = vpop.eup %1753  ;;  %v1299_v15 = vadd.f32 %v1298_v2, %v1266_v8 }
 0x37e   : > { %v1756_v48 = vpop.eup %1755  ;;  %v1255_v51 = vmul.f32 %v1754_v45, %v2245_v57  ;;  %v1300_v6 = vadd.f32 %v1298_v2, %v1276_v0 }
 0x37f   : > { %v1256_v44 = vmul.f32 %v1756_v48, %v2245_v57 }
 0x380   : > { %v1280_v53 = vadd.f32 %v1279_v49, %v1255_v51  ;;  %v1307_v13 = vrot.slane %v1300_v6, 7 }
 0x381   : > { %v1290_v55 = vadd.f32 %v1289_v52, %v1256_v44 }
 0x382   : > { %v1281_v56 = vrot.slane %v1280_v53, 4  ;;  %v1311_v17 = vsel %vm1310_vm1, %v1299_v15, %v1307_v13 }
 0x383   : > { %v1291_v58 = vrot.slane %v1290_v55, 4 }
 0x384   : > { %v1282_v59 = vadd.f32 %v1281_v56, %v1280_v53 }
 0x385   : > { %v1292_v61 = vadd.f32 %v1291_v58, %v1290_v55 }
 0x386   : > { %v1283_v62 = vrot.slane %v1282_v59, 2 }
 0x387   : > { %v1293_v63 = vrot.slane %v1292_v61, 2 }
 0x388   : > { %v1284_v1 = vadd.f32 %v1283_v62, %v1282_v59 }
 0x389   : > { %v1294_v57 = vadd.f32 %v1293_v63, %v1292_v61 }
 0x38a   : > { %v1285_v4 = vrot.slane %v1284_v1, 1 }
 0x38b   : > { %v1295_v5 = vrot.slane %v1294_v57, 1 }
 0x38c   : > { %v1286_v7 = vadd.f32 %v1285_v4, %v1284_v1 }
 0x38d   : > { %v1296_v9 = vadd.f32 %v1295_v5, %v1294_v57 }
 0x38e   : > { %v1301_v10 = vadd.f32 %v1298_v2, %v1286_v7 }
 0x38f   : > { %v1302_v12 = vadd.f32 %v1298_v2, %v1296_v9 }
 0x390   : > { %v1308_v14 = vrot.slane %v1301_v10, 6 }
 0x391   : > { %v1309_v16 = vrot.slane %v1302_v12, 5 }
 0x393   : > { %v1313_v19 = vsel %vm1312_vm2, %v1308_v14, %v1309_v16 }
 0x394   : > { %v1315_v20 = vsel %vm1314_vm3, %v1311_v17, %v1313_v19 }
 0x395   : > { %1321 = vst.msk [vmem:[%s271_s14] sm:$0xf] %vm1319_vm4, %v1315_v20 }
 0x396   : > { %1784 = shalt.err (!%p1781_p3)
}
 0x397   : > { %1514 = dma.vmem_to_hbm [thread:$0]  (%p1902_p5), %s1336_s15, 64, %s1338_s16, %s1323_s24  }
 0x398 PF: > { %p1520_p4 = scmp.ge.s32.totalorder %s1819_s29, 2  ;;  %s1349_s25 = sand.u32 1, %s1807_s26  }
 0x399   : > { %s1350_s30 = scalar_lea.sflag [#allocation4], %s1349_s25 }
 0x39a   : > { %p1517_p7 = pnand %p1520_p4, %p1906_p6 }
 0x39c   : > { %p1518_p8 = pneg %p1517_p7 }
 0x39e   : > { %1802 = dma.done.wait (%p1518_p8), %s1350_s30, 64  }
 0x39f   : > { %1804 = vsyncadd (%p1518_p8), %s1350_s30, 4294967232  ;;  %p18_p9 = scmp.ge.s32.totalorder %s1888_s8, 4   ;;  %s2315_s26 = smov %s1811_s27 }
 0x3a0   : > { %s2316_s27 = smov %s1815_s28  ;;  %s2317_s28 = smov %s1900_s11 }
 0x3a1   : > { %s2318_s29 = smov %s1888_s8  ;;  %20 = sbr.rel (!%p18_p9) target bundleno = 5 (0x5), region = 89 }
 0x3a6   :  { %1356 = vsyncpa [#allocation4], 1 }
 0x3a7   :  { %1358 = vsyncpa [#allocation4 + $0x1], 1 }

</bundles_post_ra>
